<compile_context>
chip_gen: v7x
topology: tpu7x:2x2x1
jax: 0.10.0
libtpu: 0.0.40
codegen_flags: <defaults>
</compile_context>

<pallas_src>
import jax
import jax.numpy as jnp
from jax.experimental import pallas as pl
from jax.experimental.pallas import tpu as pltpu

NUM_CLASSES = 5
C_PAD = 128  # lane-dense padded class dimension


def _round_up(x, m):
    return (x + m - 1) // m * m


# ---------------------------------------------------------------------------
# Kernel 1: inference path  logits = x @ W_pad + b_pad   (lane-dense output)
# ---------------------------------------------------------------------------
def _linear_kernel(x_ref, w_ref, b_ref, o_ref):
    acc = jnp.dot(x_ref[...], w_ref[...], preferred_element_type=jnp.float32)
    o_ref[...] = (acc + b_ref[...]).astype(o_ref.dtype)


def linear_pallas(x, w_pad, b_pad):
    B, F = x.shape
    TB = min(_round_up(B, 8), 1024)
    grid = (pl.cdiv(B, TB),)
    out = pl.pallas_call(
        _linear_kernel,
        out_shape=jax.ShapeDtypeStruct((B, C_PAD), jnp.float32),
        grid=grid,
        in_specs=[
            pl.BlockSpec((TB, F), lambda i: (i, 0)),
            pl.BlockSpec((F, C_PAD), lambda i: (0, 0)),   # weights VMEM-resident
            pl.BlockSpec((1, C_PAD), lambda i: (0, 0)),   # bias VMEM-resident
        ],
        out_specs=pl.BlockSpec((TB, C_PAD), lambda i: (i, 0)),
        compiler_params=pltpu.CompilerParams(
            dimension_semantics=("parallel",)),
        cost_estimate=pl.CostEstimate(
            flops=2 * B * F * C_PAD,
            transcendentals=0,
            bytes_accessed=4 * (B * F + F * C_PAD + C_PAD + B * C_PAD)),
    )(x, w_pad, b_pad)
    # padded lanes carry ~-1e30 (from the baked-in bias mask); slice them away
    return out[:, :NUM_CLASSES]


# ---------------------------------------------------------------------------
# Kernel 2: FUSED linear + cross-entropy.  Emits per-example losses (B, 1);
# the (tiny) mean reduction happens in the wrapper so the batch grid axis
# stays fully parallel (megacore-friendly, no serialized accumulator).
# ---------------------------------------------------------------------------
def _fused_xent_kernel(x_ref, w_ref, b_ref, y_ref, loss_ref):
    # logits for this batch tile, straight on the MXU (no HBM roundtrip).
    # Padded class lanes already hold ~-1e30 via the pre-poisoned bias.
    logits = jnp.dot(x_ref[...], w_ref[...],
                     preferred_element_type=jnp.float32) + b_ref[...]  # (TB, C_PAD)

    # numerically stable log-sum-exp over the real classes
    # (padded lanes contribute exp(-1e30 - m) == 0)
    m = jnp.max(logits, axis=-1, keepdims=True)
    lse = jnp.log(jnp.sum(jnp.exp(logits - m), axis=-1, keepdims=True)) + m

    # gather logit at the target class with a single vector compare/select
    y_vec = y_ref[...]                                                 # (TB, 1) int32
    col_iota = jax.lax.broadcasted_iota(jnp.int32, logits.shape, 1)
    picked = jnp.sum(jnp.where(col_iota == y_vec, logits, 0.0),
                     axis=-1, keepdims=True)

    # per-example loss; rows past the real batch (ragged last tile) are simply
    # clipped on output writeback, and row-wise math never mixes rows.
    loss_ref[...] = lse - picked


def fused_xent_pallas(x, y, w_pad, b_pad):
    B, F = x.shape
    TB = min(_round_up(B, 8), 512)
    grid = (pl.cdiv(B, TB),)
    y2 = y.astype(jnp.int32).reshape(B, 1)

    per_example = pl.pallas_call(
        _fused_xent_kernel,
        out_shape=jax.ShapeDtypeStruct((B, 1), jnp.float32),
        grid=grid,
        in_specs=[
            pl.BlockSpec((TB, F), lambda i: (i, 0)),
            pl.BlockSpec((F, C_PAD), lambda i: (0, 0)),
            pl.BlockSpec((1, C_PAD), lambda i: (0, 0)),
            pl.BlockSpec((TB, 1), lambda i: (i, 0)),     # labels: one vector load
        ],
        out_specs=pl.BlockSpec((TB, 1), lambda i: (i, 0)),
        compiler_params=pltpu.CompilerParams(
            dimension_semantics=("parallel",)),
        cost_estimate=pl.CostEstimate(
            flops=2 * B * F * C_PAD + 10 * B * C_PAD,
            transcendentals=B * C_PAD,
            bytes_accessed=4 * (B * F + F * C_PAD + C_PAD + 2 * B)),
    )(x, w_pad, b_pad, y2)

    # tiny final reduction (B floats) outside the kernel -> keeps the grid parallel
    return jnp.sum(per_example) / jnp.float32(B)


# ---------------------------------------------------------------------------
# Wrapper reproducing TorchModel.forward(x, y=None)
# ---------------------------------------------------------------------------
class PallasTorchModel:
    def __init__(self, input_size, key):
        k_w, k_b = jax.random.split(key)
        # deterministic init mimicking nn.Linear's uniform(-1/sqrt(F), 1/sqrt(F));
        # PyTorch stores weight as (5, input_size); we keep the transpose (F, 5)
        bound = 1.0 / (input_size ** 0.5)
        self.w_t = jax.random.uniform(
            k_w, (input_size, NUM_CLASSES), jnp.float32, -bound, bound)
        self.b = jax.random.uniform(
            k_b, (NUM_CLASSES,), jnp.float32, -bound, bound)
        # lane-dense padded copies built once:
        #  * weights: zeros in padded class lanes
        #  * bias: large-negative (-1e30, NOT -inf) in padded lanes so the fused
        #    loss kernel needs no per-step lane masking and no inf-inf NaN risk
        self.w_pad = jnp.zeros((input_size, C_PAD), jnp.float32
                               ).at[:, :NUM_CLASSES].set(self.w_t)
        self.b_pad = jnp.full((1, C_PAD), -1e30, jnp.float32
                              ).at[:, :NUM_CLASSES].set(self.b)
        # TODO(synk): for the memory-bound large-batch regime, store w_pad/x in
        # bfloat16 (f32 accumulate) to halve HBM reads; kept f32 here to match
        # the PyTorch f32 reference exactly.

    def forward(self, x, y=None):
        # TODO(synk): the PyTorch module's print()/input() calls are interactive
        # debug glue with no kernel equivalent; skipped.
        if y is not None:
            return fused_xent_pallas(x, y, self.w_pad, self.b_pad)
        return linear_pallas(x, self.w_pad, self.b_pad)


if __name__ == "__main__":
    key = jax.random.PRNGKey(0)
    k_model, k_x, k_y = jax.random.split(key, 3)

    batch, input_size = 8, 32
    model = PallasTorchModel(input_size, k_model)

    x = jax.random.normal(k_x, (batch, input_size), jnp.float32)
    y = jax.random.randint(k_y, (batch,), 0, NUM_CLASSES, jnp.int32)

    # inference path (no labels)
    y_pred = jax.block_until_ready(model.forward(x))
    assert y_pred.shape == (batch, NUM_CLASSES)

    # training path (fused linear + cross-entropy)
    loss = jax.block_until_ready(model.forward(x, y))

    # sanity check against pure-JAX reference
    ref_logits = x @ model.w_t + model.b
    ref_loss = jnp.mean(
        jax.nn.logsumexp(ref_logits, axis=-1)
        - ref_logits[jnp.arange(batch), y])
    assert jnp.allclose(y_pred, ref_logits, atol=1e-5), "logits mismatch"
    assert jnp.allclose(loss, ref_loss, atol=1e-5), "loss mismatch"

    print("KERNEL_OK")
</pallas_src>

<mosaic_0001>
module attributes {stable_mosaic.version = 11 : i64} {
  func.func @_linear_kernel(%arg0: i32, %arg1: memref<8x32xf32, #tpu.memory_space<vmem>>, %arg2: memref<32x128xf32, #tpu.memory_space<vmem>>, %arg3: memref<1x128xf32, #tpu.memory_space<vmem>>, %arg4: memref<8x128xf32, #tpu.memory_space<vmem>>) attributes {dimension_semantics = [#tpu.dimension_semantics<parallel>], iteration_bounds = array<i64: 1>, scalar_prefetch = 0 : i64, scratch_operands = 0 : i64, tpu.core_type = #tpu.core_type<tc>, window_params = [{transform_indices = @transform_0, window_bounds = array<i64: 8, 32>}, {pipeline_mode = #tpu.pipeline_mode<synchronous>, transform_indices = @transform_1, window_bounds = array<i64: 32, 128>}, {pipeline_mode = #tpu.pipeline_mode<synchronous>, transform_indices = @transform_2, window_bounds = array<i64: 1, 128>}, {transform_indices = @transform_3, window_bounds = array<i64: 8, 128>}]} {
    %c0 = arith.constant 0 : index
    %c0_0 = arith.constant 0 : index
    %0 = vector.load %arg1[%c0, %c0_0] : memref<8x32xf32, #tpu.memory_space<vmem>>, vector<8x32xf32>
    %c0_1 = arith.constant 0 : index
    %c0_2 = arith.constant 0 : index
    %1 = vector.load %arg2[%c0_1, %c0_2] : memref<32x128xf32, #tpu.memory_space<vmem>>, vector<32x128xf32>
    %cst = arith.constant dense<0.000000e+00> : vector<8x128xf32>
    %2 = tpu.matmul %0, %1, %cst {dimension_numbers = #tpu.dot_dimension_numbers<[1], [0], [0], [1], [0, 0, 1, 1], [], []>} : vector<8x32xf32>, vector<32x128xf32>, vector<8x128xf32> -> vector<8x128xf32>
    %c0_3 = arith.constant 0 : index
    %c0_4 = arith.constant 0 : index
    %3 = vector.load %arg3[%c0_3, %c0_4] : memref<1x128xf32, #tpu.memory_space<vmem>>, vector<1x128xf32>
    %4 = vector.broadcast %3 : vector<1x128xf32> to vector<8x128xf32>
    %5 = arith.addf %2, %4 : vector<8x128xf32>
    %c0_5 = arith.constant 0 : index
    %c0_6 = arith.constant 0 : index
    %6 = vector.load %arg4[%c0_5, %c0_6] : memref<8x128xf32, #tpu.memory_space<vmem>>, vector<8x128xf32>
    tpu.vector_store %arg4[%c0_5, %c0_6], %5 {strides = array<i32>} : memref<8x128xf32, #tpu.memory_space<vmem>>, vector<8x128xf32>,
    return
  }
  func.func @transform_0(%arg0: i32) -> (i32, i32) {
    %c0_i32 = arith.constant 0 : i32
    %c0_i32_0 = arith.constant 0 : i32
    return %arg0, %c0_i32 : i32, i32
  }
  func.func @transform_1(%arg0: i32) -> (i32, i32) {
    %c0_i32 = arith.constant 0 : i32
    %c0_i32_0 = arith.constant 0 : i32
    %c0_i32_1 = arith.constant 0 : i32
    return %c0_i32, %c0_i32_0 : i32, i32
  }
  func.func @transform_2(%arg0: i32) -> (i32, i32) {
    %c0_i32 = arith.constant 0 : i32
    %c0_i32_0 = arith.constant 0 : i32
    %c0_i32_1 = arith.constant 0 : i32
    return %c0_i32, %c0_i32_0 : i32, i32
  }
  func.func @transform_3(%arg0: i32) -> (i32, i32) {
    %c0_i32 = arith.constant 0 : i32
    %c0_i32_0 = arith.constant 0 : i32
    return %arg0, %c0_i32 : i32, i32
  }
}

</mosaic_0001>

<bundles_post_ra>
// kernel: tpu_custom_call.1
= control target key start
LH: loop header
LB: loop body
LE: loop exit
PB: predicated region body
PF: predicated region fallthrough
CT: control target
= control target key end

     0   :  { %8 = vsyncpa [#allocation3], 0  ;;  %s322_s0 = inlined_call_operand.hbm [shape: f32[8,32], index: 0, kind: input, shape index: {}]   ;;  %s323_s1 = inlined_call_operand.hbm [shape: f32[32,128], index: 1, kind: input, shape index: {}]   ;;  %s324_s2 = inlined_call_operand.vmem [shape: f32[1,128], index: 2, kind: input, shape index: {}]   ;;  %s325_s3 = inlined_call_operand.hbm [shape: f32[8,128], index: 3, kind: output, shape index: {}]  }
   0x1   :  { %9 = vsyncpa [#allocation6], 0 }
   0x2   :  { %10 = vsyncpa [#allocation4], 0  ;;  %s248_s12 = smov [#allocation2]   ;;  %s249_s14 = smov [#allocation5]  }
   0x3   :  { %s17_s13 = sshll.u32 %s248_s12, 4  ;;  %s26_s15 = sshll.u32 %s249_s14, 4  ;;  %s18_s13 = int_to_ptr.vmem [resolvable:$true] %s17_s13  ;;  %s276_s15 = int_to_ptr.vmem [resolvable:$true] %s26_s15 }
   0x4   :  { %s176_s18 = scalar_lea.hbm %s322_s0, 128 }
   0x5   :  { %p177_p0 = scmp.ne.s32.totalorder %s322_s0, %s176_s18  ;;  %p180_p1 = scmp.lt.u32.totalorder %s176_s18, %s322_s0 }
   0x7   :  { %p182_p2 = pnand %p180_p1, %p177_p0 }
   0x9   :  { %185 = shalt.err (!%p182_p2)
}
   0xa   :  { %s186_s23 = scalar_lea.vmem %s18_s13, 128  ;;  %p191_p4 = scmp.lt.s32.totalorder %s18_s13, %s18_s13 }
   0xb   :  { %p187_p3 = scmp.ne.s32.totalorder %s18_s13, %s186_s23  ;;  %p192_p5 = scmp.lt.s32.totalorder %s186_s23, %s186_s23 }
   0xd   :  { %p193_p6 = por %p192_p5, %p191_p4 }
   0xf   :  { %p194_p7 = pnand %p193_p6, %p187_p3 }
  0x11   :  { %197 = shalt.err (!%p194_p7)
}
  0x12   :  { %20 = dma.hbm_to_vmem [thread:$0]  %s322_s0, 128, %s18_s13, [#allocation3]  }
  0x13   :  { %s198_s28 = scalar_lea.hbm %s323_s1, 512 }
  0x14   :  { %p199_p8 = scmp.ne.s32.totalorder %s323_s1, %s198_s28  ;;  %p202_p9 = scmp.lt.u32.totalorder %s198_s28, %s323_s1 }
  0x16   :  { %p204_p10 = pnand %p202_p9, %p199_p8 }
  0x18   :  { %207 = shalt.err (!%p204_p10)
}
  0x19   :  { %s208_s6 = scalar_lea.vmem %s276_s15, 512  ;;  %p213_p12 = scmp.lt.s32.totalorder %s276_s15, %s276_s15 }
  0x1a   :  { %p209_p11 = scmp.ne.s32.totalorder %s276_s15, %s208_s6  ;;  %p214_p13 = scmp.lt.s32.totalorder %s208_s6, %s208_s6 }
  0x1c   :  { %p215_p0 = por %p214_p13, %p213_p12 }
  0x1e   :  { %p216_p1 = pnand %p215_p0, %p209_p11 }
  0x20   :  { %219 = shalt.err (!%p216_p1)
}
  0x21   :  { %s250_s0 = smov 128   ;;  %s251_s7 = smov 8  }
  0x22   :  { %32 = dma.hbm_to_vmem [thread:$0]  %s323_s1, 512, %s276_s15, [#allocation6], %s250_s0, %s250_s0, %s251_s7  }
  0x23   :  { %242 = dma.done.wait [#allocation3], 128  }
  0x24   :  { %243 = vsyncadd [#allocation3], 4294967168 }
  0x25   :  { %244 = dma.done.wait [#allocation6], 512  }
  0x26   :  { %245 = vsyncadd [#allocation6], 4294966784  ;;  %v252_v0 = vmov 0.0|0.0   ;;  %vm253_vm0 = vmmov 0   ;;  %v254_v1 = vmov 0.0   ;;  %v42_v2 = vld [vmem:[#allocation5] sm:$0xff] }
  0x27   :  { %162 = vmatprep.subr.bf16.mxu0 %v252_v0  ;;  %159 = vmatprep.mubr.msk.f32.mxu0 %vm253_vm0, %v254_v1  ;;  %v43_v3 = vld [vmem:[#allocation5 + $0x8] sm:$0xff]  ;;  %v44_v4 = vld [vmem:[#allocation5 + $0x10] sm:$0xff]  ;;  %v45_v6 = vld [vmem:[#allocation5 + $0x18] sm:$0xff]  ;;  %vm53_vm1 = vcmask 261120   ;;  %s255_s11 = smov [#allocation7]  }
  0x28   :  { %v163_v5 = vpack.c.bf16 %v43_v3, %v42_v2  ;;  %v166_v7 = vpack.c.bf16 %v45_v6, %v44_v4  ;;  %v41_v8 = vld [vmem:[#allocation2] sm:$0xff]  ;;  %s134_s12 = sshll.u32 %s255_s11, 4  ;;  %s135_s12 = int_to_ptr.vmem [resolvable:$true] %s134_s12 }
  0x29   :  { %v144_v9 = vld [vmem:[%s324_s2] ss:$0 sm:$0xff]  ;;  %s220_s13 = scalar_lea.vmem %s135_s12, 128  ;;  %p225_p3 = scmp.lt.s32.totalorder %s135_s12, %s135_s12 }
  0x2a   :  { %164 = vmatpush3.bf16.msra.mxu0 %v163_v5  ;;  %p221_p2 = scmp.ne.s32.totalorder %s135_s12, %s220_s13  ;;  %p226_p4 = scmp.lt.s32.totalorder %s220_s13, %s220_s13 }
  0x2b   :  { %165 = vmatprep.subr.bf16.mxu0 %v252_v0 }
  0x2c   :  { %p227_p5 = por %p226_p4, %p225_p3 }
  0x2e   :  { %167 = vmatpush3.bf16.msra.mxu0 %v166_v7  ;;  %p228_p6 = pnand %p227_p5, %p221_p2 }
  0x31   :  { %160 = vmatmul.mubr.msk.f32.vlgmr.msra.gmra.mrb[0].mxu0 %vm53_vm1, %v41_v8 }
 0x104   :  { %v123_v10 = vpop.f32.mrb[0].mxu0 }
 0x105   :  { %v124_v11 = vadd.f32 %v144_v9, %v123_v10  ;;  %v161_v12 = vpop.f32.mrb[1].mxu0 }
 0x107   :  { %127 = vst [vmem:[#allocation7] sm:$0xff] %v124_v11 }
 0x108   :  { %231 = shalt.err (!%p228_p6)
}
 0x109   :  { %s232_s16 = scalar_lea.hbm %s325_s3, 128 }
 0x10a   :  { %p233_p7 = scmp.ne.s32.totalorder %s325_s3, %s232_s16  ;;  %p236_p8 = scmp.lt.u32.totalorder %s232_s16, %s325_s3 }
 0x10c   :  { %p238_p9 = pnand %p236_p8, %p233_p7 }
 0x10e   :  { %241 = shalt.err (!%p238_p9)
}
 0x10f   :  { %137 = dma.vmem_to_hbm [thread:$0]  %s135_s12, 128, %s325_s3, [#allocation4]  }
 0x110   :  { %246 = dma.done.wait [#allocation4], 128  }
 0x111   :  { %247 = vsyncadd [#allocation4], 4294967168 }
 0x112   :  { %141 = vsyncpa [#allocation3], 1 }
 0x113   :  { %142 = vsyncpa [#allocation6], 1 }
 0x114   :  { %143 = vsyncpa [#allocation4], 1 }

</bundles_post_ra>
